<compile_context>
chip_gen: v5e
topology: v5e:2x2
jax: 0.10.0
libtpu: 0.0.40
codegen_flags: <defaults>
</compile_context>

<pallas_src>
import functools
import math

import jax
import jax.numpy as jnp
from jax import lax
from jax.experimental import pallas as pl
from jax.experimental.pallas import tpu as pltpu


def _xlogx(x: float) -> float:
    # xlogy(x, x) with the 0*log(0) == 0 convention, evaluated on the host.
    return x * math.log(x) if x > 0.0 else 0.0


def _round_up(x: int, m: int) -> int:
    return ((x + m - 1) // m) * m


# ----------------------------------------------------------------------------
# Kernel: accumulates sum(smoothed_target * prediction) into a lane-dense
# (8, lane_w) partial-sum block per row chunk.
# ----------------------------------------------------------------------------
def _label_smoothing_kernel(pred_ref, tgt_ref, out_ref, *,
                            alpha, vocab_size, pad_index,
                            n_rows, v_total, tiles_per_chunk, mask_cols):
    c = pl.program_id(0)          # row chunk (parallel axis)
    r = pl.program_id(1)          # row tile within the chunk (arbitrary)
    v = pl.program_id(2)          # vocab tile (arbitrary)

    # The output block is the resident per-chunk accumulator: zero it at the
    # first (r, v) step of every chunk.
    @pl.when((r == 0) & (v == 0))
    def _init():
        out_ref[...] = jnp.zeros_like(out_ref)

    p = pred_ref[...].astype(jnp.float32)      # (tn, tv), widened in vregs
    t = tgt_ref[...]                           # (tn, 1) int32 token ids
    tn, tv = p.shape
    lane_w = out_ref.shape[1]

    # Smoothed-target values (host Python floats -> immediates).
    uni = alpha / (vocab_size - 2)             # every non-target (incl. pad) column
    on_val = (1.0 - alpha) + uni               # target column of a non-pad row

    # Row validity: real row (not grid padding / clamped overflow tile) and not a
    # pad-token row (torch's masked_fill_ zeroes those rows entirely).
    row_tile = c * tiles_per_chunk + r         # UNclamped logical row-tile index
    row_ids = row_tile * tn + lax.broadcasted_iota(jnp.int32, (tn, 1), 0)
    row_ok = (t != pad_index) & (row_ids < n_rows)

    # Column iota compared against the target id shifted into tile-local
    # coordinates (cheaper than adding v*tv to the full (tn, tv) iota).
    lane = lax.broadcasted_iota(jnp.int32, (tn, tv), 1)
    is_on = lane == (t - v * tv)

    # smoothed_target * prediction; invalid rows/columns are select-zeroed
    # (jnp.where also kills NaN garbage in out-of-bounds block regions).
    pm = jnp.where(row_ok, p, 0.0)
    if mask_cols:                              # only emitted when V % tv != 0
        pm = jnp.where(lane < (v_total - v * tv), pm, 0.0)
    prod = jnp.where(is_on, on_val, uni) * pm  # (tn, tv)

    # Lane-dense reduction (tn, tv) -> (8, lane_w) with vreg-aligned static slices
    # and pure VPU adds; the single cross-lane reduce happens in the wrapper.
    part = prod[:, 0:lane_w]
    for k in range(1, tv // lane_w):
        part = part + prod[:, k * lane_w:(k + 1) * lane_w]
    rows = part[0:8, :]
    for k in range(1, tn // 8):
        rows = rows + part[k * 8:(k + 1) * 8, :]

    out_ref[...] += rows


# ----------------------------------------------------------------------------
# Wrapper
# ----------------------------------------------------------------------------
def label_smoothing_loss(prediction, target, *, vocab_size, pad_index, alpha,
                         row_tile=None, vocab_tile=None, num_chunks=None):
    V = prediction.shape[-1]
    pred2d = prediction.reshape(-1, V)            # native dtype: no extra HBM pass
    tgt = target.reshape(-1).astype(jnp.int32)
    n = pred2d.shape[0]
    tgt2d = tgt.reshape(n, 1)
    itemsize = pred2d.dtype.itemsize

    # ---- vocab (lane) tiling: multiples of 128 lanes when possible ----
    if V % 128 == 0:
        want = vocab_tile if vocab_tile is not None else 4096
        tv = max(128, (min(want, V) // 128) * 128)
    else:
        tv = V                                    # small / odd vocab: full width
    n_vtiles = pl.cdiv(V, tv)
    mask_cols = (V % tv) != 0
    lane_w = 128 if tv % 128 == 0 else tv

    # ---- row (sublane) tiling: keep a pred block ~2 MiB (Pallas double-buffers) ----
    if row_tile is None:
        row_tile = min(512, max(8, (2 * 1024 * 1024) // (tv * itemsize)))
    tn = max(8, (min(row_tile, _round_up(n, 8)) // 8) * 8)
    n_row_tiles = pl.cdiv(n, tn)

    # ---- outer parallel axis (second TensorCore on v7x; harmless on v5e/v6e) ----
    if num_chunks is None:
        num_chunks = min(n_row_tiles, 8)
    num_chunks = max(1, min(num_chunks, n_row_tiles))
    tiles_per_chunk = pl.cdiv(n_row_tiles, num_chunks)
    last_tile = n_row_tiles - 1

    def row_block(c, r):
        # Clamp overflow tiles of the last chunk onto a valid block; the kernel's
        # row-index mask zeroes their contribution.
        return jnp.minimum(c * tiles_per_chunk + r, last_tile)

    kern = functools.partial(
        _label_smoothing_kernel,
        alpha=float(alpha), vocab_size=int(vocab_size), pad_index=int(pad_index),
        n_rows=n, v_total=V, tiles_per_chunk=tiles_per_chunk, mask_cols=mask_cols)

    part_sums = pl.pallas_call(
        kern,
        out_shape=jax.ShapeDtypeStruct((num_chunks * 8, lane_w), jnp.float32),
        grid=(num_chunks, tiles_per_chunk, n_vtiles),
        in_specs=[
            pl.BlockSpec((tn, tv), lambda c, r, v: (row_block(c, r), v)),
            pl.BlockSpec((tn, 1), lambda c, r, v: (row_block(c, r), 0)),
        ],
        out_specs=pl.BlockSpec((8, lane_w), lambda c, r, v: (c, 0)),
        compiler_params=pltpu.CompilerParams(
            dimension_semantics=("parallel", "arbitrary", "arbitrary"),
            vmem_limit_bytes=32 * 1024 * 1024),
    )(pred2d, tgt2d)

    # kl_div = sum(xlogy(t, t)) - sum(t * prediction).  The first term depends only
    # on the targets (two distinct smoothed values per non-pad row), so it collapses
    # to (#non-pad rows) * host constant; the kernel computed the second term.
    uni = float(alpha) / (vocab_size - 2)
    on_val = (1.0 - float(alpha)) + uni
    ent_per_row = _xlogx(on_val) + (V - 1) * _xlogx(uni)
    n_nonpad = jnp.sum((tgt != pad_index).astype(jnp.float32))
    return n_nonpad * ent_per_row - jnp.sum(part_sums)


# ----------------------------------------------------------------------------
# Pure-JAX reference (mirrors the torch code literally) for validation
# ----------------------------------------------------------------------------
def label_smoothing_ref(prediction, target, *, vocab_size, pad_index, alpha):
    V = prediction.shape[-1]
    pred2d = prediction.reshape(-1, V).astype(jnp.float32)
    tgt = target.reshape(-1)
    one_hot = jax.nn.one_hot(tgt, V, dtype=jnp.float32)
    one_hot = one_hot.at[:, pad_index].set(0.0)
    smoothed = one_hot * (1.0 - alpha) + alpha / (vocab_size - 2)
    smoothed = jnp.where((tgt == pad_index)[:, None], 0.0, smoothed)
    ent = jnp.where(smoothed > 0, smoothed * jnp.log(smoothed), 0.0)
    return jnp.sum(ent - smoothed * pred2d)


# ----------------------------------------------------------------------------
if __name__ == "__main__":
    vocab_size = 256      # lane-dense vocab (multiple of 128)
    pad_index = 0
    alpha = 0.1
    B, S = 2, 23          # N = 46 rows -> exercises partial row tiles

    key = jax.random.PRNGKey(0)
    kp, kt = jax.random.split(key)

    logits = jax.random.normal(kp, (B, S, vocab_size), jnp.float32)
    prediction = jax.nn.log_softmax(logits, axis=-1)      # kl_div expects log-probs
    target = jax.random.randint(kt, (B, S), 0, vocab_size, dtype=jnp.int32)
    target = target.at[:, -3:].set(pad_index)             # exercise pad-row masking

    cases = [
        # f32 input, small tiles: multi-chunk / multi-row-tile / multi-vocab-tile grid
        ("f32-tiled", prediction, dict(row_tile=8, vocab_tile=128, num_chunks=4)),
        # bf16 input (native-dtype streaming + in-kernel upcast), same grid
        ("bf16-tiled", prediction.astype(jnp.bfloat16),
         dict(row_tile=8, vocab_tile=128, num_chunks=4)),
        # bf16 input with automatic (large-tile) configuration
        ("bf16-auto", prediction.astype(jnp.bfloat16), dict()),
    ]

    for name, pred, kwargs in cases:
        loss = jax.block_until_ready(
            label_smoothing_loss(pred, target, vocab_size=vocab_size,
                                 pad_index=pad_index, alpha=alpha, **kwargs))
        ref = label_smoothing_ref(pred, target, vocab_size=vocab_size,
                                  pad_index=pad_index, alpha=alpha)
        assert jnp.isfinite(loss), (name, loss)
        assert jnp.allclose(loss, ref, rtol=1e-4, atol=1e-2), (name, loss, ref)

    print("KERNEL_OK")
</pallas_src>

<mosaic_0001>
module attributes {stable_mosaic.version = 11 : i64} {
  func.func @_label_smoothing_kernel(%arg0: i32, %arg1: i32, %arg2: i32, %arg3: memref<8x128xf32, #tpu.memory_space<vmem>>, %arg4: memref<8x1xi32, #tpu.memory_space<vmem>>, %arg5: memref<8x128xf32, #tpu.memory_space<vmem>>) attributes {dimension_semantics = [#tpu.dimension_semantics<parallel>, #tpu.dimension_semantics<arbitrary>, #tpu.dimension_semantics<arbitrary>], iteration_bounds = array<i64: 4, 2, 2>, scalar_prefetch = 0 : i64, scratch_operands = 0 : i64, tpu.core_type = #tpu.core_type<tc>, window_params = [{transform_indices = @transform_0, window_bounds = array<i64: 8, 128>}, {transform_indices = @transform_1, window_bounds = array<i64: 8, 1>}, {transform_indices = @transform_2, window_bounds = array<i64: 8, 128>}]} {
    %c0_i32 = arith.constant 0 : i32
    %0 = arith.cmpi eq, %arg1, %c0_i32 : i32
    %c0_i32_0 = arith.constant 0 : i32
    %1 = arith.cmpi eq, %arg2, %c0_i32_0 : i32
    %2 = arith.andi %0, %1 : i1
    %3 = arith.extui %2 : i1 to i32
    %c0_i32_1 = arith.constant 0 : i32
    %4 = arith.cmpi ne, %3, %c0_i32_1 : i32
    scf.if %4 {
      %cst_12 = arith.constant 0.000000e+00 : f32
      %35 = vector.broadcast %cst_12 : f32 to vector<8x128xf32>
      %c0_13 = arith.constant 0 : index
      %c0_14 = arith.constant 0 : index
      %36 = vector.load %arg5[%c0_13, %c0_14] : memref<8x128xf32, #tpu.memory_space<vmem>>, vector<8x128xf32>
      tpu.vector_store %arg5[%c0_13, %c0_14], %35 {strides = array<i32>} : memref<8x128xf32, #tpu.memory_space<vmem>>, vector<8x128xf32>,
    } else {
    }
    %c0 = arith.constant 0 : index
    %c0_2 = arith.constant 0 : index
    %5 = vector.load %arg3[%c0, %c0_2] : memref<8x128xf32, #tpu.memory_space<vmem>>, vector<8x128xf32>
    %c0_3 = arith.constant 0 : index
    %c0_4 = arith.constant 0 : index
    %6 = vector.load %arg4[%c0_3, %c0_4] : memref<8x1xi32, #tpu.memory_space<vmem>>, vector<8x1xi32>
    %c2_i32 = arith.constant 2 : i32
    %7 = arith.muli %arg0, %c2_i32 : i32
    %8 = arith.addi %7, %arg1 : i32
    %c8_i32 = arith.constant 8 : i32
    %9 = arith.muli %8, %c8_i32 : i32
    %10 = tpu.iota {dimensions = array<i32: 0>} : vector<8x1xi32>
    %11 = vector.broadcast %9 : i32 to vector<8x1xi32>
    %12 = arith.addi %11, %10 : vector<8x1xi32>
    %c0_i32_5 = arith.constant 0 : i32
    %13 = vector.broadcast %c0_i32_5 : i32 to vector<8x1xi32>
    %14 = arith.cmpi ne, %6, %13 : vector<8x1xi32>
    %c46_i32 = arith.constant 46 : i32
    %15 = vector.broadcast %c46_i32 : i32 to vector<8x1xi32>
    %16 = arith.cmpi slt, %12, %15 : vector<8x1xi32>
    %17 = arith.andi %14, %16 : vector<8x1xi1>
    %18 = tpu.iota {dimensions = array<i32: 1>} : vector<8x128xi32>
    %c128_i32 = arith.constant 128 : i32
    %19 = arith.muli %arg2, %c128_i32 : i32
    %20 = vector.broadcast %19 : i32 to vector<8x1xi32>
    %21 = arith.subi %6, %20 : vector<8x1xi32>
    %22 = vector.broadcast %21 : vector<8x1xi32> to vector<8x128xi32>
    %23 = arith.cmpi eq, %18, %22 : vector<8x128xi32>
    %cst = arith.constant 0.000000e+00 : f32
    %24 = vector.shape_cast %17 : vector<8x1xi1> to vector<8x1xi1>
    %25 = vector.broadcast %24 : vector<8x1xi1> to vector<8x128xi1>
    %26 = vector.broadcast %cst : f32 to vector<8x128xf32>
    %27 = arith.select %25, %5, %26 : vector<8x128xi1>, vector<8x128xf32>
    %cst_6 = arith.constant 0.900393724 : f32
    %cst_7 = arith.constant 3.93700786E-4 : f32
    %28 = vector.broadcast %cst_6 : f32 to vector<8x128xf32>
    %29 = vector.broadcast %cst_7 : f32 to vector<8x128xf32>
    %30 = arith.select %23, %28, %29 : vector<8x128xi1>, vector<8x128xf32>
    %31 = arith.mulf %30, %27 : vector<8x128xf32>
    %c0_8 = arith.constant 0 : index
    %c0_9 = arith.constant 0 : index
    %32 = vector.load %arg5[%c0_8, %c0_9] : memref<8x128xf32, #tpu.memory_space<vmem>>, vector<8x128xf32>
    %33 = arith.addf %32, %31 : vector<8x128xf32>
    %c0_10 = arith.constant 0 : index
    %c0_11 = arith.constant 0 : index
    %34 = vector.load %arg5[%c0_10, %c0_11] : memref<8x128xf32, #tpu.memory_space<vmem>>, vector<8x128xf32>
    tpu.vector_store %arg5[%c0_10, %c0_11], %33 {strides = array<i32>} : memref<8x128xf32, #tpu.memory_space<vmem>>, vector<8x128xf32>,
    return
  }
  func.func @transform_0(%arg0: i32, %arg1: i32, %arg2: i32) -> (i32, i32) {
    %c2_i32 = arith.constant 2 : i32
    %0 = arith.muli %arg0, %c2_i32 : i32
    %1 = arith.addi %0, %arg1 : i32
    %c5_i32 = arith.constant 5 : i32
    %2 = arith.minsi %1, %c5_i32 : i32
    %c0_i32 = arith.constant 0 : i32
    return %2, %arg2 : i32, i32
  }
  func.func @transform_1(%arg0: i32, %arg1: i32, %arg2: i32) -> (i32, i32) {
    %c2_i32 = arith.constant 2 : i32
    %0 = arith.muli %arg0, %c2_i32 : i32
    %1 = arith.addi %0, %arg1 : i32
    %c5_i32 = arith.constant 5 : i32
    %2 = arith.minsi %1, %c5_i32 : i32
    %c0_i32 = arith.constant 0 : i32
    %c0_i32_0 = arith.constant 0 : i32
    return %2, %c0_i32 : i32, i32
  }
  func.func @transform_2(%arg0: i32, %arg1: i32, %arg2: i32) -> (i32, i32) {
    %c0_i32 = arith.constant 0 : i32
    %c0_i32_0 = arith.constant 0 : i32
    return %arg0, %c0_i32 : i32, i32
  }
}

</mosaic_0001>

<bundles_post_ra>
// kernel: tpu_custom_call.1
= control target key start
LH: loop header
LB: loop body
LE: loop exit
PB: predicated region body
PF: predicated region fallthrough
CT: control target
= control target key end

     0   :  { %7 = vsyncpa [#allocation3], 0  ;;  %s971_s0 = inlined_call_operand.hbm [shape: f32[46,256], index: 0, kind: input, shape index: {}]   ;;  %s972_s1 = inlined_call_operand.vmem [shape: s32[46,1], index: 1, kind: input, shape index: {}]   ;;  %s973_s2 = inlined_call_operand.hbm [shape: f32[32,128], index: 2, kind: output, shape index: {}]  }
   0x1   :  { %9 = vsyncpa [#allocation3 + $0x1], 0 }
   0x2   :  { %10 = vsyncpa [#allocation4], 0 }
   0x3   :  { %12 = vsyncpa [#allocation4 + $0x1], 0  ;;  %s738_s9 = smov 0   ;;  %s740_s10 = smov 0  }
   0x4   :  { %s742_s11 = smov 0   ;;  %s744_s12 = smov 0  }
   0x5   :  { %s746_s13 = smov 0   ;;  %s748_s14 = smov 0  }
   0x6   :  { %s750_s15 = smov 0   ;;  %s752_s16 = smov 0  }
   0x7   :  { %s754_s17 = smov 0   ;;  %s756_s18 = smov 0  }
   0x8   :  { %s758_s19 = smov 0   ;;  %s760_s20 = smov 0  }
   0x9   :  { %s762_s21 = smov 0  }
   0xa LB: > { %979 = sst [smem:[#allocation8_spill]] %s710_s19  ;;  %s401_s22 = sadd.s32 4294967295, %s718_s21   ;;  %s718_s21 = sphi %s762_s21, %s18_s21   ;;  %s714_s20 = sphi %s760_s20, %s996_s20   ;;  %s710_s19 = sphi %s758_s19, %s995_s19   ;;  %s706_s18 = sphi %s756_s18, %s1004_s18   ;;  %s702_s17 = sphi %s754_s17, %s993_s17   ;;  %s698_s16 = sphi %s752_s16, %s992_s16   ;;  %s694_s15 = sphi %s750_s15, %s1003_s15   ;;  %s690_s14 = sphi %s748_s14, %s1002_s14   ;;  %s686_s13 = sphi %s746_s13, %s1001_s13   ;;  %s682_s12 = sphi %s744_s12, %s1000_s12   ;;  %s678_s11 = sphi %s742_s11, %s999_s11   ;;  %s674_s10 = sphi %s740_s10, %s998_s10   ;;  %s670_s9 = sphi %s738_s9, %s997_s9  }
   0xb   : > { %980 = sst [smem:[#allocation9_spill]] %s714_s20  ;;  %s402_s23 = sadd.s32 4294967294, %s718_s21  }
   0xc   : > { %s30_s24 = sadd.s32 1, %s706_s18  ;;  %s33_s25 = sadd.s32 1, %s710_s19 }
   0xd   : > { %p31_p0 = scmp.ge.s32.totalorder %s30_s24, 2  ;;  %s37_s26 = sadd.s32 1, %s714_s20 }
   0xe   : > { %s403_s27 = sshll.u32 %s714_s20, 1  ;;  %p61_p3 = scmp.ne.s32.totalorder %s690_s14, %s686_s13 }
   0xf   : > { %s1006_s24 = smov (%p31_p0, %s30_s24), 0  ;;  %s1008_s25 = smov (!%p31_p0, %s33_s25), %s710_s19 }
  0x10   : > { %981 = sst [smem:[#allocation10_spill]] %s1006_s24  ;;  %s42_s29 = sadd.s32 %s710_s19, %s403_s27 }
  0x11   : > { %s50_s30 = ssub.s32 %s706_s18, %s1006_s24  ;;  %p35_p1 = scmp.ge.s32.totalorder %s1008_s25, 2 }
  0x12   : > { %p43_p2 = scmp.lt.s32.totalorder %s42_s29, 5  ;;  %p62_p4 = scmp.eq.s32.totalorder %s718_s21, 0 }
  0x13   : > { %s1010_s25 = smov (%p35_p1, %s1008_s25), 0  ;;  %s1012_s26 = smov (!%p35_p1, %s37_s26), %s714_s20 }
  0x14   : > { %982 = sst [smem:[#allocation11_spill]] %s1010_s25  ;;  %s1014_s29 = smov (!%p43_p2, %s42_s29), 5 }
  0x15   : > { %p39_p5 = scmp.ge.s32.totalorder %s1012_s26, 4  ;;  %p824_p6 = por %p62_p4, %p61_p3 }
  0x16   : > { %p67_p7 = scmp.ne.s32.totalorder %s686_s13, %s682_s12  ;;  %p68_p8 = scmp.eq.s32.totalorder %s401_s22, 0 }
  0x17   : > { %s1016_s26 = smov (%p39_p5, %s1012_s26), 0  ;;  %s114_s5 = sadd.s32 1, %s678_s11 }
  0x18   : > { %984 = sst [smem:[#allocation12_spill]] %s1016_s26  ;;  %p834_p9 = por %p68_p8, %p67_p7 }
  0x19   : > { %s404_s6 = sshll.u32 %s1016_s26, 1  ;;  %s111_s7 = ssub.s32 %s714_s20, %s1016_s26 }
  0x1a   : > { %s46_s8 = sadd.s32 %s404_s6, %s1010_s25  ;;  %p112_p10 = scmp.eq.s32.totalorder %s111_s7, 0 }
  0x1b   : > { %p47_p11 = scmp.lt.s32.totalorder %s46_s8, 5  ;;  %p124_p12 = scmp.ne.s32.totalorder %s678_s11, %s674_s10 }
  0x1c   : > { %s846_s12 = scalar_select %p112_p10, %s678_s11, %s114_s5  }
  0x1d   : > { %s1018_s8 = smov (!%p47_p11, %s46_s8), 5  ;;  %p125_p13 = scmp.eq.s32.totalorder %s401_s22, 15 }
  0x1e   : > { %986 = sst [smem:[#allocation13_spill]] %s846_s12  ;;  %p130_p0 = scmp.ne.s32.totalorder %s674_s10, %s670_s9 }
  0x1f   : > { %s49_s27 = ssub.s32 %s1014_s29, %s1018_s8  ;;  %p131_p1 = scmp.eq.s32.totalorder %s402_s23, 15 }
  0x20   : > { %s51_s28 = sor.u32 %s50_s30, %s49_s27  ;;  %p855_p2 = por %p125_p13, %p124_p12 }
  0x21   : > { %p52_p3 = scmp.eq.s32.totalorder %s51_s28, 0  ;;  %p859_p4 = por %p131_p1, %p130_p0 }
  0x22   : > { %p440_p5 = scmp.lt.s32.totalorder %s718_s21, 16  ;;  %s989_s5 = sadd.s32 1, %s690_s14 }
  0x23   : > { %s867_s22 = scalar_select %p52_p3, %s690_s14, %s989_s5  }
  0x24   : > { %s151_s7 = sand.u32 1, %s690_s14   ;;  %s411_s8 = sshll.u32 %s1014_s29, 1 }
  0x25   : > { %s409_s23 = sshll.u32 %s151_s7, 3  ;;  %s163_s30 = sadd.s32 %s706_s18, %s411_s8 }
  0x26   : > { %s412_s27 = sshll.u32 %s163_s30, 3  ;;  %s155_s25 = scalar_lea.vmem [#allocation2], %s409_s23 }
  0x27   : > { %s169_s24 = sshll.u32 %s155_s25, 4  ;;  %s165_s28 = scalar_lea.hbm %s971_s0, %s412_s27  ;;  %s170_s24 = int_to_ptr.vmem [resolvable:$true] %s169_s24 }
  0x28   : > { %s167_s12 = sshll.u32 %s165_s28, 4  ;;  %p433_p7 = pnand %p440_p5, %p824_p6  ;;  %s168_s12 = int_to_ptr.hbm [resolvable:$true] %s167_s12 }
  0x29   : > { %p413_p8 = scmp.ge.s32.totalorder %s718_s21, 1  ;;  %p189_p10 = scmp.lt.s32.totalorder %s718_s21, 17 }
  0x2a   : > { %s152_s5 = scalar_lea.sflag [#allocation3], %s151_s7 }
  0x2b   : > { %435 = dma.hbm_to_vmem [thread:$0]  (!%p433_p7), %s168_s12, 128, %s170_s24, %s152_s5  }
  0x2c   : > { %p190_p11 = pnand %p413_p8, %p189_p10 }
  0x2d   : > { %s195_s29 = sand.u32 (!%p190_p11), 1, %s686_s13  }
  0x2e   : > { %193 = sbr.rel (%p190_p11) target bundleno = 202 (0xca), region = 28  ;;  %s880_s8 = sshll.u32 (!%p190_p11), %s195_s29, 3 }
  0x2f   : > { %s196_s25 = scalar_lea.sflag (!%p190_p11), [#allocation3], %s195_s29  ;;  %s199_s19 = scalar_lea.vmem (!%p190_p11), [#allocation2], %s880_s8 }
  0x33   : > { %661 = dma.done.wait (%p834_p9), %s196_s25, 128  }
  0x34   : > { %663 = vsyncadd (%p834_p9), %s196_s25, 4294967168  ;;  %s226_s20 = sand.u32 1, %s674_s10   ;;  %s416_s24 = sshll.u32 %s702_s17, 1 }
  0x35   : > { %s415_s3 = sshll.u32 %s226_s20, 3  ;;  %s234_s12 = sadd.s32 %s698_s16, %s416_s24 }
  0x36   : > { %p235_p6 = scmp.lt.s32.totalorder %s234_s12, 5  ;;  %p245_p12 = scmp.eq.s32.totalorder %s698_s16, 0 }
  0x37   : > { %p246_p13 = scmp.eq.s32.totalorder %s694_s15, 0  ;;  %s897_s28 = scalar_lea.vmem [#allocation5], %s415_s3 }
  0x38   : > { %s236_s7 = scalar_select %p235_p6, %s234_s12, 5 }
  0x39   : > { %p247_p0 = pnand %p246_p13, %p245_p12 }
  0x3a   : > { %s1020_s7 = smov (!%p235_p6, %s236_s7), 5 }
  0x3b   : > { %s420_s23 = sshll.u32 %s1020_s7, 3  ;;  %250 = sbr.rel (%p247_p0) target bundleno = 66 (0x42), region = 36 }
  0x3c   : > { %s240_s27 = scalar_lea.vmem %s972_s1, %s420_s23 }
  0x40   : > { %v720_v0 = vmov 0.0  }
  0x41   : > { %251 = vst [vmem:[%s897_s28] sm:$0xff] %v720_v0 }
  0x42 PF: > { %v253_v1 = vld [vmem:[%s240_s27] sm:$0xff]  ;;  %s422_s5 = sshll.u32 %s234_s12, 3  ;;  %v257_v2 = vlaneseq  ;;  %s423_s16 = sshll.u32 %s694_s15, 7  ;;  %v721_v3 = vmov 0   ;;  %v722_v14 = vmov 0.0003937008  }
  0x43   : > { %549 = vset.pattern.permute.xlu0 %v721_v3  ;;  %v259_v4 = vstv %s422_s5  ;;  %v267_v5 = vstv %s423_s16  ;;  %vm261_vm0 = vcmp.ne.s32.totalorder %v253_v1, 0  ;;  %s425_s15 = sshll.u32 %s702_s17, 3  ;;  %v252_v12 = vld [vmem:[%s199_s19] sm:$0xff]  ;;  %s297_s3 = sshll.u32 %s897_s28, 4  ;;  %s298_s3 = int_to_ptr.vmem [resolvable:$true] %s297_s3 }
  0x44   : > { %v258_v6 = vshrl.u32 %v257_v2, 7  ;;  %v268_v7 = vsub.s32 %v253_v1, %v267_v5  ;;  %v265_v11 = vand.u32 127, %v257_v2  ;;  %s295_s24 = scalar_lea.hbm %s973_s2, %s425_s15  ;;  %s285_s17 = scalar_lea.sflag [#allocation4], %s226_s20 }
  0x45   : > { %s299_s12 = sshll.u32 %s295_s24, 4  ;;  %s600_s4 = scalar_lea.hbm %s973_s2, 32  ;;  %s300_s12 = int_to_ptr.hbm [resolvable:$true] %s299_s12 }
  0x46   : > { %v260_v8 = vadd.s32 %v259_v4, %v258_v6  ;;  %270 = vperm.xlu0 %549, %v268_v7   ;;  %s594_s8 = sshra.s32 %s300_s12, 4  ;;  %s595_s8 = int_to_ptr.hbm [resolvable:$true] %s594_s8 }
  0x47   : > { %s596_s19 = scalar_lea.hbm %s595_s8, 8  ;;  %p601_p5 = scmp.lt.s32.totalorder %s595_s8, %s973_s2 }
  0x48   : > { %vm262_vm1 = vcmp.lt.s32.totalorder %v260_v8, 46  ;;  %v281_v16 = vld [vmem:[%s897_s28] sm:$0xff]  ;;  %p597_p9 = scmp.ne.s32.totalorder %s595_s8, %s596_s19  ;;  %p602_p7 = scmp.lt.s32.totalorder %s600_s4, %s596_s19 }
  0x49   : > { %vm263_vm2 = vmand %vm261_vm0, %vm262_vm1 }
  0x4a   : > { %v273_v9 = vsel %vm263_vm2, 1, %v721_v3  ;;  %p598_p1 = pnand %p597_p9, %p855_p2  ;;  %p603_p8 = por %p602_p7, %p601_p5 }
  0x4c   : > { %p599_p3 = pneg %p598_p1 }
  0x4e   : > { %275 = vperm.xlu0 %549, %v273_v9   ;;  %p604_p10 = pnand %p603_p8, %p599_p3 }
  0xb8   : > { %v271_v10 = vpop.permute.xlu0 %270 }
  0xb9   : > { %vm272_vm3 = vcmp.eq.s32.totalorder %v265_v11, %v271_v10 }
  0xba   : > { %v279_v15 = vsel %vm272_vm3, 0.9003937, %v722_v14 }
  0xc0   : > { %v276_v13 = vpop.permute.xlu0 %275 }
  0xc1   : > { %vm277_vm4 = vcmp.eq.s32.totalorder %v276_v13, 1 }
  0xc2   : > { %v278_v17 = vsel %vm277_vm4, %v252_v12, 0.0 }
  0xc3   : > { %v280_v18 = vmul.f32 %v279_v15, %v278_v17 }
  0xc5   : > { %v282_v19 = vadd.f32 %v281_v16, %v280_v18 }
  0xc7   : > { %283 = vst [vmem:[%s897_s28] sm:$0xff] %v282_v19 }
  0xc8   : > { %607 = shalt.err (!%p604_p10)
}
  0xc9   : > { %430 = dma.vmem_to_hbm [thread:$0]  (%p855_p2), %s298_s3, 128, %s300_s12, %s285_s17  }
  0xca PF: > { %p441_p11 = scmp.ge.s32.totalorder %s718_s21, 2  ;;  %s311_s20 = sand.u32 1, %s670_s9  }
  0xcb   : > { %s312_s28 = scalar_lea.sflag [#allocation4], %s311_s20 }
  0xcc   : > { %p437_p6 = pnand %p441_p11, %p859_p4 }
  0xce   : > { %p438_p12 = pneg %p437_p6 }
  0xd0   : > { %665 = dma.done.wait (%p438_p12), %s312_s28, 128  }
  0xd1   : > { %667 = vsyncadd (%p438_p12), %s312_s28, 4294967168  ;;  %s18_s21 = sadd.s32 1, %s718_s21   ;;  %s991_s26 = sld [smem:[#allocation13_spill]] }
  0xd2   : > { %p927_p13 = scmp.ge.s32.totalorder %s18_s21, 18   ;;  %s992_s16 = sld [smem:[#allocation8_spill]] }
  0xd3   : > { %s993_s17 = sld [smem:[#allocation9_spill]]  ;;  %s997_s9 = smov %s674_s10 }
  0xd4   : > { %s994_s6 = sld [smem:[#allocation10_spill]]  ;;  %s998_s10 = smov %s678_s11 }
  0xd5   : > { %s995_s19 = sld [smem:[#allocation11_spill]]  ;;  %s1000_s12 = smov %s686_s13 }
  0xd6   : > { %s996_s20 = sld [smem:[#allocation12_spill]]  ;;  %s1001_s13 = smov %s690_s14 }
  0xd7   : > { %s999_s11 = smov %s991_s26  ;;  %s1002_s14 = smov %s867_s22 }
  0xd8   : > { %s1003_s15 = smov %s706_s18  ;;  %17 = sbr.rel (!%p927_p13) target bundleno = 10 (0xa), region = 80 }
  0xda   : > { %s1004_s18 = smov %s994_s6 }
  0xdd   :  { %318 = vsyncpa [#allocation3], 1 }
  0xde   :  { %320 = vsyncpa [#allocation3 + $0x1], 1 }
  0xdf   :  { %321 = vsyncpa [#allocation4], 1 }
  0xe0   :  { %323 = vsyncpa [#allocation4 + $0x1], 1 }

</bundles_post_ra>
